<compile_context>
chip_gen: v5e
topology: v5e:2x2
jax: 0.10.0
libtpu: 0.0.40
codegen_flags: <defaults>
</compile_context>

<pallas_src>
import functools

import jax
import jax.numpy as jnp
from jax.experimental import pallas as pl
from jax.experimental.pallas import tpu as pltpu

_LANE = 128
_HALO = 128   # lane-aligned halo block; supports kernel_size - 1 <= 128


def _round_up(x, m):
    return ((x + m - 1) // m) * m


def _swish(y, approx_sigmoid):
    if approx_sigmoid:
        # exp and the approximate reciprocal both run on the EUP slot,
        # keeping the VALU free (matters most on v5e).
        return y * pl.reciprocal(1.0 + jnp.exp(-y), approx=True)
    return y * jax.nn.sigmoid(y)


def _window(xm_ref, xh_ref):
    """(C_in_p, tile_t + _HALO) conv window for the current time tile."""
    return jnp.concatenate([xm_ref[0], xh_ref[0]], axis=-1)


def _dsconv_kernel_vpu(xm_ref, xh_ref, dw_ref, pw_ref, bias_ref, o_ref, *,
                       kernel_size, tile_t, activation, approx_sigmoid,
                       matmul_dtype):
    """Depthwise taps on the VPU + one pointwise MXU matmul (small channels)."""
    xw = _window(xm_ref, xh_ref)                 # (C_in_p, tile_t + HALO)
    dw = dw_ref[...]                             # (C_in_p, K), f32
    # Depthwise conv (stride=1), unrolled over taps; static lane slices of the
    # halo window (no full-window roll).  f32 taps promote the MAC to f32.
    acc = dw[:, 0:1] * xw[:, :tile_t]
    for k in range(1, kernel_size):
        acc = acc + dw[:, k:k + 1] * xw[:, k:k + tile_t]
    # Pointwise 1x1 conv == channel matmul on the MXU (BN scale pre-folded).
    y = jnp.dot(pw_ref[...], acc.astype(matmul_dtype),
                preferred_element_type=jnp.float32)
    y = y + bias_ref[...]
    if activation:
        y = _swish(y, approx_sigmoid)
    o_ref[0] = y.astype(o_ref.dtype)


def _dsconv_kernel_mxu(xm_ref, xh_ref, wk_ref, bias_ref, o_ref, *,
                       kernel_size, tile_t, activation, approx_sigmoid,
                       matmul_dtype):
    """Whole layer as K MXU matmuls: y = sum_k W_k @ x[:, k:k+tile_t] + b."""
    xw = _window(xm_ref, xh_ref).astype(matmul_dtype)
    y = jnp.dot(wk_ref[0], xw[:, :tile_t], preferred_element_type=jnp.float32)
    for k in range(1, kernel_size):
        y = y + jnp.dot(wk_ref[k], xw[:, k:k + tile_t],
                        preferred_element_type=jnp.float32)
    y = y + bias_ref[...]
    if activation:
        y = _swish(y, approx_sigmoid)
    o_ref[0] = y.astype(o_ref.dtype)


def depthwise_separable_1d_cnn_layer(x, x_len, params, *, kernel_size, stride,
                                     padding, activation=True,
                                     matmul_dtype=None, dw_on_mxu=None,
                                     approx_sigmoid=False, tile_t=None):
    """Forward pass matching the PyTorch module (stride == 1 path)."""
    assert stride == 1, "only stride=1 implemented in this Pallas kernel"
    assert kernel_size - 1 <= _HALO, "kernel_size too large for the fixed halo"

    B, C_in, T = x.shape
    C_out = params["pw_weight"].shape[0]
    pad_l = (kernel_size - 1) // 2 if stride == 1 else padding
    T_out = (T + 2 * pad_l - (kernel_size - 1) - 1) // stride + 1

    # Length update: same arithmetic as the torch module (x_len unchanged for
    # stride == 1, even when an even kernel_size shortens the output by one).
    if x_len is not None:
        if stride == 1:
            x_len = (x_len - 1) // stride + 1
        else:
            x_len = (x_len + 2 * padding - (kernel_size - 1) - 1) // stride + 1

    if matmul_dtype is None:
        matmul_dtype = (jnp.bfloat16 if x.dtype == jnp.dtype(jnp.bfloat16)
                        else jnp.float32)
    matmul_dtype = jnp.dtype(matmul_dtype)
    is_bf16_mm = matmul_dtype == jnp.dtype(jnp.bfloat16)
    if dw_on_mxu is None:
        # Folding the depthwise taps into K pointwise matmuls only pays once
        # the channel count gives the MXU decent occupancy.
        dw_on_mxu = min(C_in, C_out) >= 128

    # ---- per-generation budgets ---------------------------------------------
    try:
        vmem_cap = int(pltpu.get_tpu_info().vmem_capacity_bytes)
    except Exception:                       # conservative (v7x-sized) fallback
        vmem_cap = 64 * 1024 * 1024
    vmem_limit = min(int(vmem_cap * 3 // 4), 100 * 1024 * 1024)
    tile_t_max = 2048 if vmem_cap >= (96 << 20) else 1024

    # ---- tiling ---------------------------------------------------------------
    sub = 16 if (is_bf16_mm or x.dtype == jnp.dtype(jnp.bfloat16)) else 8
    C_in_p = _round_up(C_in, sub)
    C_out_p = _round_up(C_out, sub)

    in_bytes = jnp.dtype(x.dtype).itemsize
    w_bytes = matmul_dtype.itemsize

    if tile_t is None:
        tile_t = min(_round_up(T_out, _LANE), tile_t_max)

        def vmem_estimate(tt):
            return (2 * C_in_p * (tt + _HALO) * in_bytes          # input blocks (x2)
                    + 2 * C_out_p * tt * in_bytes                 # output blocks (x2)
                    + 2 * kernel_size * C_out_p * C_in_p * w_bytes  # weights (x2)
                    + 4 * C_in_p * (tt + _HALO) * 4               # window/acc temps
                    + 2 * C_out_p * tt * 4)                       # f32 result temp

        while tile_t > _LANE and vmem_estimate(tile_t) > 0.6 * vmem_limit:
            tile_t = _round_up(tile_t // 2, _LANE)
    assert tile_t % _LANE == 0, "tile_t must be a multiple of 128 lanes"

    num_t = pl.cdiv(T_out, tile_t)
    T_out_pad = num_t * tile_t
    T_in_total = T_out_pad + _HALO
    halo_blocks = tile_t // _HALO

    # Single fused pad: channel alignment + left conv pad + right halo/align.
    x_pad = jnp.pad(
        x, ((0, 0), (0, C_in_p - C_in), (pad_l, T_in_total - pad_l - T)))

    # ---- constant folding (wrapper-side, exact algebra) -----------------------
    f32 = jnp.float32
    eps = 1e-5
    scale = params["bn_gamma"].astype(f32) / jnp.sqrt(
        params["bn_running_var"].astype(f32) + eps)
    shift = (params["bn_beta"].astype(f32)
             - scale * params["bn_running_mean"].astype(f32))
    pw = params["pw_weight"].reshape(C_out, C_in).astype(f32)
    dw = params["dw_weight"].reshape(C_in, kernel_size).astype(f32)
    pw_fused = scale[:, None] * pw                               # (C_out, C_in)
    bias_fused = scale * (pw @ params["dw_bias"].astype(f32)
                          + params["pw_bias"].astype(f32)) + shift
    bias = jnp.zeros((C_out_p, 1), f32).at[:C_out, 0].set(bias_fused)

    # ---- specs -----------------------------------------------------------------
    x_main_spec = pl.BlockSpec((1, C_in_p, tile_t), lambda t, b: (b, 0, t))
    # Same padded array, viewed in 128-lane blocks: the halo of tile t is the
    # 128 lanes right after it -> block index (t + 1) * (tile_t / 128).
    x_halo_spec = pl.BlockSpec(
        (1, C_in_p, _HALO), lambda t, b: (b, 0, (t + 1) * halo_blocks))
    bias_spec = pl.BlockSpec((C_out_p, 1), lambda t, b: (0, 0))
    out_spec = pl.BlockSpec((1, C_out_p, tile_t), lambda t, b: (b, 0, t))

    common = dict(kernel_size=kernel_size, tile_t=tile_t, activation=activation,
                  approx_sigmoid=approx_sigmoid, matmul_dtype=matmul_dtype)

    if dw_on_mxu:
        # W_k = diag(bn_scale) @ pw @ diag(dw[:, k])  (exact algebra): the
        # depthwise MACs move from the VPU onto the (otherwise idle) MXU.
        wk = jnp.einsum("oc,ck->koc", pw_fused, dw)              # (K, C_out, C_in)
        wk_p = jnp.zeros((kernel_size, C_out_p, C_in_p), matmul_dtype)
        wk_p = wk_p.at[:, :C_out, :C_in].set(wk.astype(matmul_dtype))
        kernel = functools.partial(_dsconv_kernel_mxu, **common)
        weight_args = (wk_p, bias)
        weight_specs = [
            pl.BlockSpec((kernel_size, C_out_p, C_in_p),
                         lambda t, b: (0, 0, 0)),
            bias_spec,
        ]
    else:
        dw_p = jnp.zeros((C_in_p, kernel_size), f32).at[:C_in, :].set(dw)
        pw_p = jnp.zeros((C_out_p, C_in_p), matmul_dtype).at[:C_out, :C_in].set(
            pw_fused.astype(matmul_dtype))
        kernel = functools.partial(_dsconv_kernel_vpu, **common)
        weight_args = (dw_p, pw_p, bias)
        weight_specs = [
            pl.BlockSpec((C_in_p, kernel_size), lambda t, b: (0, 0)),
            pl.BlockSpec((C_out_p, C_in_p), lambda t, b: (0, 0)),
            bias_spec,
        ]

    out = pl.pallas_call(
        kernel,
        out_shape=jax.ShapeDtypeStruct((B, C_out_p, T_out_pad), x.dtype),
        grid_spec=pltpu.PrefetchScalarGridSpec(
            num_scalar_prefetch=0,
            # Time tiles lead so megacore sharding still splits work when B==1.
            grid=(num_t, B),
            in_specs=[x_main_spec, x_halo_spec, *weight_specs],
            out_specs=out_spec,
        ),
        compiler_params=pltpu.CompilerParams(
            dimension_semantics=("parallel", "parallel"),
            vmem_limit_bytes=vmem_limit),
    )(x_pad, x_pad, *weight_args)

    if C_out_p != C_out or T_out_pad != T_out:
        out = out[:, :C_out, :T_out]
    return out, x_len


def _reference(x, params, *, kernel_size, activation):
    """Plain-JAX reference (stride=1, 'same' padding) for correctness checks."""
    B, C_in, T = x.shape
    C_out = params["pw_weight"].shape[0]
    pad = (kernel_size - 1) // 2
    T_out = T + 2 * pad - kernel_size + 1
    x_pad = jnp.pad(x.astype(jnp.float32), ((0, 0), (0, 0), (pad, pad)))
    dw = params["dw_weight"].reshape(C_in, kernel_size)
    acc = jnp.zeros((B, C_in, T_out), jnp.float32)
    for k in range(kernel_size):
        acc = acc + dw[None, :, k:k + 1] * x_pad[:, :, k:k + T_out]
    acc = acc + params["dw_bias"][None, :, None]
    pw = params["pw_weight"].reshape(C_out, C_in)
    y = jnp.einsum("oc,bct->bot", pw, acc) + params["pw_bias"][None, :, None]
    eps = 1e-5
    scale = params["bn_gamma"] / jnp.sqrt(params["bn_running_var"] + eps)
    shift = params["bn_beta"] - scale * params["bn_running_mean"]
    y = scale[None, :, None] * y + shift[None, :, None]
    if activation:
        y = y * jax.nn.sigmoid(y)
    return y


def _make_params(key, C_in, C_out, K):
    ks = jax.random.split(key, 8)
    return {
        # nn.Conv1d(C_in, C_in, K, groups=C_in): weight (C_in,1,K), bias (C_in,)
        "dw_weight": 0.1 * jax.random.normal(ks[0], (C_in, 1, K), jnp.float32),
        "dw_bias": 0.1 * jax.random.normal(ks[1], (C_in,), jnp.float32),
        # nn.Conv1d(C_in, C_out, 1): weight (C_out,C_in,1), bias (C_out,)
        "pw_weight": 0.1 * jax.random.normal(ks[2], (C_out, C_in, 1), jnp.float32),
        "pw_bias": 0.1 * jax.random.normal(ks[3], (C_out,), jnp.float32),
        # nn.BatchNorm1d(C_out), inference-mode stats
        "bn_gamma": 1.0 + 0.1 * jax.random.normal(ks[4], (C_out,), jnp.float32),
        "bn_beta": 0.1 * jax.random.normal(ks[5], (C_out,), jnp.float32),
        "bn_running_mean": 0.1 * jax.random.normal(ks[6], (C_out,), jnp.float32),
        "bn_running_var": 1.0 + 0.1 * jnp.abs(
            jax.random.normal(ks[7], (C_out,), jnp.float32)),
    }


if __name__ == "__main__":
    root = jax.random.PRNGKey(0)
    k_small, k_big, kx1, kx2 = jax.random.split(root, 4)

    # ---- case 1: tiny single-tile layer, VPU depthwise path, exact Swish ----
    B, C_in, C_out, T, K = 2, 4, 8, 16, 3
    x = jax.random.normal(kx1, (B, C_in, T), dtype=jnp.float32)
    x_len = jnp.array([16, 12], dtype=jnp.int32)
    params = _make_params(k_small, C_in, C_out, K)
    ref = _reference(x, params, kernel_size=K, activation=True)

    out, new_len = depthwise_separable_1d_cnn_layer(
        x, x_len, params, kernel_size=K, stride=1, padding=1,
        activation=True, matmul_dtype=jnp.float32, dw_on_mxu=False)
    out = jax.block_until_ready(out)
    assert out.shape == (B, C_out, T), out.shape
    assert jnp.allclose(out, ref, atol=2e-5, rtol=2e-5), "case1 mismatch"
    assert jnp.array_equal(new_len, x_len), "case1 x_len mismatch"

    # ---- case 2: multi-tile (num_t > 1) exercising the halo blocks ----------
    B2, C_in2, C_out2, T2, K2 = 2, 6, 10, 300, 5
    x2 = jax.random.normal(kx2, (B2, C_in2, T2), dtype=jnp.float32)
    x_len2 = jnp.array([300, 257], dtype=jnp.int32)
    params2 = _make_params(k_big, C_in2, C_out2, K2)
    ref2 = _reference(x2, params2, kernel_size=K2, activation=True)

    out2, new_len2 = depthwise_separable_1d_cnn_layer(
        x2, x_len2, params2, kernel_size=K2, stride=1, padding=2,
        activation=True, matmul_dtype=jnp.float32, dw_on_mxu=False,
        tile_t=128)                     # force 3 time tiles
    out2 = jax.block_until_ready(out2)
    assert out2.shape == (B2, C_out2, T2), out2.shape
    assert jnp.allclose(out2, ref2, atol=2e-5, rtol=2e-5), "case2 mismatch"
    assert jnp.array_equal(new_len2, x_len2), "case2 x_len mismatch"

    # ---- case 3: depthwise-on-MXU path (K folded matmul weights) ------------
    out3, _ = depthwise_separable_1d_cnn_layer(
        x2, x_len2, params2, kernel_size=K2, stride=1, padding=2,
        activation=True, matmul_dtype=jnp.float32, dw_on_mxu=True,
        tile_t=128)
    out3 = jax.block_until_ready(out3)
    assert jnp.allclose(out3, ref2, atol=1e-4, rtol=1e-4), "case3 mismatch"

    # ---- case 4: bf16 MXU weights + approx Swish (perf path, loose tol) -----
    out4, _ = depthwise_separable_1d_cnn_layer(
        x2, x_len2, params2, kernel_size=K2, stride=1, padding=2,
        activation=True, matmul_dtype=jnp.bfloat16, dw_on_mxu=True,
        approx_sigmoid=True, tile_t=128)
    out4 = jax.block_until_ready(out4)
    assert jnp.allclose(out4, ref2, atol=5e-2, rtol=5e-2), "case4 mismatch"

    print("KERNEL_OK")
</pallas_src>

<mosaic_0001>
module attributes {stable_mosaic.version = 11 : i64} {
  func.func @_dsconv_kernel_vpu(%arg0: i32, %arg1: i32, %arg2: memref<1x8x128xf32, #tpu.memory_space<vmem>>, %arg3: memref<1x8x128xf32, #tpu.memory_space<vmem>>, %arg4: memref<8x3xf32, #tpu.memory_space<vmem>>, %arg5: memref<8x8xf32, #tpu.memory_space<vmem>>, %arg6: memref<8x1xf32, #tpu.memory_space<vmem>>, %arg7: memref<1x8x128xf32, #tpu.memory_space<vmem>>) attributes {dimension_semantics = [#tpu.dimension_semantics<parallel>, #tpu.dimension_semantics<parallel>], iteration_bounds = array<i64: 1, 2>, scalar_prefetch = 0 : i64, scratch_operands = 0 : i64, tpu.core_type = #tpu.core_type<tc>, window_params = [{transform_indices = @transform_0, window_bounds = array<i64: 1, 8, 128>}, {transform_indices = @transform_1, window_bounds = array<i64: 1, 8, 128>}, {pipeline_mode = #tpu.pipeline_mode<synchronous>, transform_indices = @transform_2, window_bounds = array<i64: 8, 3>}, {pipeline_mode = #tpu.pipeline_mode<synchronous>, transform_indices = @transform_3, window_bounds = array<i64: 8, 8>}, {pipeline_mode = #tpu.pipeline_mode<synchronous>, transform_indices = @transform_4, window_bounds = array<i64: 8, 1>}, {transform_indices = @transform_5, window_bounds = array<i64: 1, 8, 128>}]} {
    %c0 = arith.constant 0 : index
    %c0_0 = arith.constant 0 : index
    %c0_1 = arith.constant 0 : index
    %0 = vector.load %arg2[%c0, %c0_0, %c0_1] : memref<1x8x128xf32, #tpu.memory_space<vmem>>, vector<1x8x128xf32>
    %1 = vector.shape_cast %0 : vector<1x8x128xf32> to vector<8x128xf32>
    %c0_2 = arith.constant 0 : index
    %c0_3 = arith.constant 0 : index
    %c0_4 = arith.constant 0 : index
    %2 = vector.load %arg3[%c0_2, %c0_3, %c0_4] : memref<1x8x128xf32, #tpu.memory_space<vmem>>, vector<1x8x128xf32>
    %3 = vector.shape_cast %2 : vector<1x8x128xf32> to vector<8x128xf32>
    %4 = tpu.concatenate %1, %3 in 1 : vector<8x128xf32>, vector<8x128xf32> -> vector<8x256xf32>
    %c0_5 = arith.constant 0 : index
    %c0_6 = arith.constant 0 : index
    %5 = vector.load %arg4[%c0_5, %c0_6] : memref<8x3xf32, #tpu.memory_space<vmem>>, vector<8x3xf32>
    %6 = vector.extract_strided_slice %5 {offsets = [0, 0], sizes = [8, 1], strides = [1, 1]} : vector<8x3xf32> to vector<8x1xf32>
    %7 = vector.extract_strided_slice %4 {offsets = [0, 0], sizes = [8, 128], strides = [1, 1]} : vector<8x256xf32> to vector<8x128xf32>
    %8 = vector.broadcast %6 : vector<8x1xf32> to vector<8x128xf32>
    %9 = arith.mulf %8, %7 : vector<8x128xf32>
    %10 = vector.extract_strided_slice %5 {offsets = [0, 1], sizes = [8, 1], strides = [1, 1]} : vector<8x3xf32> to vector<8x1xf32>
    %11 = vector.extract_strided_slice %4 {offsets = [0, 1], sizes = [8, 128], strides = [1, 1]} : vector<8x256xf32> to vector<8x128xf32>
    %12 = vector.broadcast %10 : vector<8x1xf32> to vector<8x128xf32>
    %13 = arith.mulf %12, %11 : vector<8x128xf32>
    %14 = arith.addf %9, %13 : vector<8x128xf32>
    %15 = vector.extract_strided_slice %5 {offsets = [0, 2], sizes = [8, 1], strides = [1, 1]} : vector<8x3xf32> to vector<8x1xf32>
    %16 = vector.extract_strided_slice %4 {offsets = [0, 2], sizes = [8, 128], strides = [1, 1]} : vector<8x256xf32> to vector<8x128xf32>
    %17 = vector.broadcast %15 : vector<8x1xf32> to vector<8x128xf32>
    %18 = arith.mulf %17, %16 : vector<8x128xf32>
    %19 = arith.addf %14, %18 : vector<8x128xf32>
    %c0_7 = arith.constant 0 : index
    %c0_8 = arith.constant 0 : index
    %20 = vector.load %arg5[%c0_7, %c0_8] : memref<8x8xf32, #tpu.memory_space<vmem>>, vector<8x8xf32>
    %cst = arith.constant dense<0.000000e+00> : vector<8x128xf32>
    %21 = tpu.matmul %20, %19, %cst {dimension_numbers = #tpu.dot_dimension_numbers<[1], [0], [0], [1], [0, 0, 1, 1], [], []>} : vector<8x8xf32>, vector<8x128xf32>, vector<8x128xf32> -> vector<8x128xf32>
    %c0_9 = arith.constant 0 : index
    %c0_10 = arith.constant 0 : index
    %22 = vector.load %arg6[%c0_9, %c0_10] : memref<8x1xf32, #tpu.memory_space<vmem>>, vector<8x1xf32>
    %23 = vector.broadcast %22 : vector<8x1xf32> to vector<8x128xf32>
    %24 = arith.addf %21, %23 : vector<8x128xf32>
    %25 = arith.negf %24 : vector<8x128xf32>
    %26 = math.exp %25 : vector<8x128xf32>
    %cst_11 = arith.constant 1.000000e+00 : f32
    %27 = vector.broadcast %cst_11 : f32 to vector<8x128xf32>
    %28 = arith.addf %27, %26 : vector<8x128xf32>
    %29 = arith.divf %27, %28 : vector<8x128xf32>
    %30 = arith.mulf %24, %29 : vector<8x128xf32>
    %c0_12 = arith.constant 0 : index
    %c0_13 = arith.constant 0 : index
    %c0_14 = arith.constant 0 : index
    %31 = vector.load %arg7[%c0_12, %c0_13, %c0_14] : memref<1x8x128xf32, #tpu.memory_space<vmem>>, vector<1x8x128xf32>
    %32 = vector.shape_cast %31 : vector<1x8x128xf32> to vector<8x128xf32>
    %33 = vector.shape_cast %30 : vector<8x128xf32> to vector<1x8x128xf32>
    tpu.vector_store %arg7[%c0_12, %c0_13, %c0_14], %33 {strides = array<i32>} : memref<1x8x128xf32, #tpu.memory_space<vmem>>, vector<1x8x128xf32>,
    return
  }
  func.func @transform_0(%arg0: i32, %arg1: i32) -> (i32, i32, i32) {
    %c0_i32 = arith.constant 0 : i32
    %c0_i32_0 = arith.constant 0 : i32
    return %arg1, %c0_i32, %arg0 : i32, i32, i32
  }
  func.func @transform_1(%arg0: i32, %arg1: i32) -> (i32, i32, i32) {
    %c1_i32 = arith.constant 1 : i32
    %0 = arith.addi %arg0, %c1_i32 : i32
    %c1_i32_0 = arith.constant 1 : i32
    %1 = arith.muli %0, %c1_i32_0 : i32
    %c0_i32 = arith.constant 0 : i32
    %c0_i32_1 = arith.constant 0 : i32
    return %arg1, %c0_i32, %1 : i32, i32, i32
  }
  func.func @transform_2(%arg0: i32, %arg1: i32) -> (i32, i32) {
    %c0_i32 = arith.constant 0 : i32
    %c0_i32_0 = arith.constant 0 : i32
    %c0_i32_1 = arith.constant 0 : i32
    return %c0_i32, %c0_i32_0 : i32, i32
  }
  func.func @transform_3(%arg0: i32, %arg1: i32) -> (i32, i32) {
    %c0_i32 = arith.constant 0 : i32
    %c0_i32_0 = arith.constant 0 : i32
    %c0_i32_1 = arith.constant 0 : i32
    return %c0_i32, %c0_i32_0 : i32, i32
  }
  func.func @transform_4(%arg0: i32, %arg1: i32) -> (i32, i32) {
    %c0_i32 = arith.constant 0 : i32
    %c0_i32_0 = arith.constant 0 : i32
    %c0_i32_1 = arith.constant 0 : i32
    return %c0_i32, %c0_i32_0 : i32, i32
  }
  func.func @transform_5(%arg0: i32, %arg1: i32) -> (i32, i32, i32) {
    %c0_i32 = arith.constant 0 : i32
    %c0_i32_0 = arith.constant 0 : i32
    return %arg1, %c0_i32, %arg0 : i32, i32, i32
  }
}

</mosaic_0001>

<bundles_post_ra>
// kernel: tpu_custom_call.1
= control target key start
LH: loop header
LB: loop body
LE: loop exit
PB: predicated region body
PF: predicated region fallthrough
CT: control target
= control target key end

     0   :  { %s960_s0 = inlined_call_operand.hbm [shape: f32[2,8,256], index: 0, kind: input, shape index: {}]   ;;  %s961_s1 = inlined_call_operand.hbm [shape: f32[2,8,256], index: 1, kind: input, shape index: {}]   ;;  %s962_s2 = inlined_call_operand.vmem [shape: f32[8,3], index: 2, kind: input, shape index: {}]   ;;  %s963_s3 = inlined_call_operand.vmem [shape: f32[8,8], index: 3, kind: input, shape index: {}]   ;;  %s964_s4 = inlined_call_operand.vmem [shape: f32[8,1], index: 4, kind: input, shape index: {}]   ;;  %s965_s5 = inlined_call_operand.hbm [shape: f32[2,8,128], index: 5, kind: output, shape index: {}]  }
   0x1   :  { %967 = sst [smem:[#allocation12_spill]] %s960_s0 }
   0x2   :  { %10 = vsyncpa [#allocation3], 0 }
   0x3   :  { %12 = vsyncpa [#allocation3 + $0x1], 0 }
   0x4   :  { %13 = vsyncpa [#allocation6], 0 }
   0x5   :  { %15 = vsyncpa [#allocation6 + $0x1], 0 }
   0x6   :  { %16 = vsyncpa [#allocation4], 0 }
   0x7   :  { %18 = vsyncpa [#allocation4 + $0x1], 0  ;;  %s810_s18 = smov 0   ;;  %s812_s19 = smov 0  }
   0x8   :  { %s814_s20 = smov 0   ;;  %s816_s21 = smov 0  }
   0x9   :  { %s818_s22 = smov 0   ;;  %s820_s23 = smov 0  }
   0xa LB: > { %s524_s24 = sadd.s32 4294967295, %s773_s23   ;;  %s525_s25 = sadd.s32 4294967294, %s773_s23   ;;  %s773_s23 = sphi %s820_s23, %s24_s23   ;;  %s769_s22 = sphi %s818_s22, %s980_s22   ;;  %s765_s21 = sphi %s816_s21, %s979_s21   ;;  %s761_s20 = sphi %s814_s20, %s978_s20   ;;  %s757_s19 = sphi %s812_s19, %s977_s19   ;;  %s753_s18 = sphi %s810_s18, %s976_s18  }
   0xb   : > { %s33_s26 = sadd.s32 1, %s769_s22  ;;  %s45_s27 = sadd.s32 1, %s761_s20 }
   0xc   : > { %p34_p0 = scmp.ge.s32.totalorder %s33_s26, 2  ;;  %p52_p1 = scmp.ne.s32.totalorder %s761_s20, %s757_s19 }
   0xd   : > { %p53_p2 = scmp.eq.s32.totalorder %s773_s23, 0  ;;  %p58_p3 = scmp.ne.s32.totalorder %s757_s19, %s753_s18 }
   0xe   : > { %s982_s26 = smov (%p34_p0, %s33_s26), 0  ;;  %p59_p5 = scmp.eq.s32.totalorder %s524_s24, 0 }
   0xf   : > { %968 = sst [smem:[#allocation11_spill]] %s982_s26  ;;  %p851_p4 = por %p53_p2, %p52_p1 }
  0x10   : > { %s40_s29 = ssub.s32 %s769_s22, %s982_s26  ;;  %p177_p6 = scmp.eq.s32.totalorder %s524_s24, 1 }
  0x11   : > { %p43_p7 = scmp.eq.s32.totalorder %s40_s29, 0  ;;  %p857_p8 = por %p59_p5, %p58_p3 }
  0x12   : > { %p861_p9 = por %p177_p6, %p52_p1  ;;  %p183_p10 = scmp.eq.s32.totalorder %s525_s25, 1 }
  0x13   : > { %s866_s7 = scalar_select %p43_p7, %s761_s20, %s45_s27  }
  0x14   : > { %p868_p11 = por %p183_p10, %p58_p3  ;;  %p527_p12 = scmp.ge.s32.totalorder %s773_s23, 2 }
  0x15   : > { %p563_p13 = scmp.lt.s32.totalorder %s773_s23, 2  ;;  %s212_s9 = sand.u32 1, %s761_s20  }
  0x16   : > { %s528_s10 = sshll.u32 %s212_s9, 3  ;;  %s544_s11 = sshll.u32 %s769_s22, 4 }
  0x17   : > { %s973_s0 = sld [smem:[#allocation12_spill]]  ;;  %s216_s15 = scalar_lea.vmem [#allocation2], %s528_s10 }
  0x18   : > { %s226_s16 = sshll.u32 %s216_s15, 4  ;;  %p881_p0 = pnand %p563_p13, %p851_p4  ;;  %s227_s16 = int_to_ptr.vmem [resolvable:$true] %s226_s16 }
  0x19   : > { %p534_p1 = scmp.ge.s32.totalorder %s773_s23, 1  ;;  %p253_p2 = scmp.lt.s32.totalorder %s773_s23, 3 }
  0x1a   : > { %s213_s25 = scalar_lea.sflag [#allocation3], %s212_s9  ;;  %s457_s12 = scalar_lea.hbm %s961_s1, %s544_s11 }
  0x1b   : > { %p254_p3 = pnand %p534_p1, %p253_p2  ;;  %s237_s13 = scalar_lea.vmem [#allocation5], %s528_s10 }
  0x1c   : > { %s458_s15 = scalar_lea.hbm %s457_s12, 8  ;;  %s895_s26 = sand.u32 (!%p254_p3), 1, %s757_s19  }
  0x1d   : > { %s222_s14 = scalar_lea.hbm %s973_s0, %s544_s11  ;;  %s246_s28 = sshll.u32 %s458_s15, 4  ;;  %s247_s28 = int_to_ptr.hbm [resolvable:$true] %s246_s28 }
  0x1e   : > { %s224_s17 = sshll.u32 %s222_s14, 4  ;;  %s248_s14 = sshll.u32 %s237_s13, 4  ;;  %s225_s17 = int_to_ptr.hbm [resolvable:$true] %s224_s17  ;;  %s249_s14 = int_to_ptr.vmem [resolvable:$true] %s248_s14 }
  0x1f   : > { %555 = dma.hbm_to_vmem [thread:$0]  (!%p881_p0), %s225_s17, 128, %s227_s16, %s213_s25  }
  0x20   : > { %s234_s0 = scalar_lea.sflag [#allocation6], %s212_s9  ;;  %257 = sbr.rel (%p254_p3) target bundleno = 448 (0x1c0), region = 40 }
  0x21   : > { %558 = dma.hbm_to_vmem [thread:$0]  (!%p881_p0), %s247_s28, 128, %s249_s14, %s234_s0  }
  0x22   : > { %s898_s16 = sshll.u32 (!%p254_p3), %s895_s26, 3  ;;  %s260_s11 = scalar_lea.sflag (!%p254_p3), [#allocation3], %s895_s26 }
  0x23   : > { %s263_s10 = scalar_lea.vmem (!%p254_p3), [#allocation2], %s898_s16 }
  0x25   : > { %740 = dma.done.wait (%p857_p8), %s260_s11, 128  }
  0x26   : > { %742 = vsyncadd (%p857_p8), %s260_s11, 4294967168  ;;  %s270_s0 = scalar_lea.sflag [#allocation6], %s895_s26  ;;  %s273_s9 = scalar_lea.vmem [#allocation5], %s898_s16 }
  0x27   : > { %744 = dma.done.wait (%p857_p8), %s270_s0, 128  }
  0x28   : > { %746 = vsyncadd (%p857_p8), %s270_s0, 4294967168  ;;  %v775_v0 = vmov 1   ;;  %v776_v1 = vmov 0   ;;  %v309_v2 = vld [vmem:[%s962_s2] sm:$0xff]  ;;  %v777_v3 = vmov 2   ;;  %v308_v5 = vld [vmem:[%s273_s9] sm:$0xff] }
  0x29   : > { %618 = vset.pattern.permute.xlu0 %v775_v0  ;;  %620 = vset.pattern.permute.xlu1 %v776_v1  ;;  %v307_v4 = vld [vmem:[%s263_s10] sm:$0xff]  ;;  %s778_s30 = smov 127   ;;  %s779_s25 = smov 126   ;;  %vm328_vm0 = vcmask 1039360   ;;  %vm344_vm1 = vcmask 1031168   ;;  %vm355_vm2 = vcmask 64512  }
  0x2a   : > { %621 = vset.pattern.permute.xlu2 %v776_v1  ;;  %317 = vperm.xlu0 %618, %v309_v2   ;;  %v349_v12 = vld [vmem:[%s964_s4] sm:$0xff]  ;;  %s541_s14 = sshll.u32 %s765_s21, 3  ;;  %s305_s10 = scalar_lea.vmem [#allocation7], %s898_s16 }
  0x2b   : > { %312 = vperm.xlu1 %620, %v309_v2   ;;  %v348_v23 = vld [vmem:[%s963_s3] sm:$0xff]  ;;  %s412_s11 = scalar_lea.hbm %s965_s5, %s541_s14  ;;  %s414_s0 = sshll.u32 %s305_s10, 4  ;;  %s415_s0 = int_to_ptr.vmem [resolvable:$true] %s414_s0 }
  0x2c   : > { %s416_s9 = sshll.u32 %s412_s11, 4  ;;  %s401_s21 = scalar_lea.sflag [#allocation4], %s895_s26  ;;  %s417_s9 = int_to_ptr.hbm [resolvable:$true] %s416_s9 }
  0x2d   : > { %s701_s17 = sshra.s32 %s417_s9, 4  ;;  %s707_s16 = scalar_lea.hbm %s965_s5, 16  ;;  %s702_s17 = int_to_ptr.hbm [resolvable:$true] %s701_s17 }
  0x2e   : > { %s703_s24 = scalar_lea.hbm %s702_s17, 8  ;;  %p708_p7 = scmp.lt.s32.totalorder %s702_s17, %s965_s5 }
  0x2f   : > { %p704_p4 = scmp.ne.s32.totalorder %s702_s17, %s703_s24  ;;  %p709_p8 = scmp.lt.s32.totalorder %s707_s16, %s703_s24 }
  0x31   : > { %p705_p5 = pnand %p704_p4, %p861_p9  ;;  %p710_p10 = por %p709_p8, %p708_p7 }
  0x32   : > { %619 = vset.pattern.permute.xlu0 %v777_v3 }
  0x33   : > { %333 = vperm.xlu0 %619, %v309_v2   ;;  %p706_p6 = pneg %p705_p5 }
  0x35   : > { %p711_p13 = pnand %p710_p10, %p706_p6 }
  0x3b   : > { %622 = vset.pattern.permute.xlu0 %v776_v1 }
  0x9c   : > { %v318_v6 = vpop.permute.xlu0 %317 }
  0x9d   : > { %v320_v7 = vmul.f32 %v318_v6, %v307_v4  ;;  %v321_v8 = vmul.f32 %v318_v6, %v308_v5  ;;  %v313_v13 = vpop.permute.xlu1 %312 }
  0x9e   : > { %v315_v17 = vmul.f32 %v313_v13, %v307_v4 }
  0x9f   : > { %326 = vrot.lane.b32.xlu2 %v321_v8, %s778_s30  ;;  %324 = vrot.lane.b32.xlu1 %v320_v7, %s778_s30 }
  0xa5   : > { %v334_v9 = vpop.permute.xlu0 %333 }
  0xa6   : > { %v336_v10 = vmul.f32 %v334_v9, %v307_v4  ;;  %v337_v11 = vmul.f32 %v334_v9, %v308_v5 }
  0xa8   : > { %340 = vrot.lane.b32.xlu2 %v336_v10, %s779_s25  ;;  %342 = vrot.lane.b32.xlu1 %v337_v11, %s779_s25 }
  0xb0   : > { %352 = vperm.xlu2 %621, %v349_v12  }
  0xf9   : > { %v327_v14 = vpop.permute.xlu2 %326 }
 0x102   : > { %v341_v18 = vpop.permute.xlu2 %340 }
 0x10a   : > { %v353_v24 = vpop.permute.xlu2 %352 }
 0x111   : > { %v325_v15 = vpop.permute.xlu1 %324 }
 0x112   : > { %v329_v16 = vsel %vm328_vm0, %v325_v15, %v327_v14 }
 0x113   : > { %v331_v20 = vadd.f32 %v329_v16, %v315_v17 }
 0x11a   : > { %v343_v19 = vpop.permute.xlu1 %342 }
 0x11b   : > { %v345_v21 = vsel %vm344_vm1, %v341_v18, %v343_v19 }
 0x11c   : > { %v347_v22 = vadd.f32 %v345_v21, %v331_v20 }
 0x11e   : > { %374 = vmatpush.msra.mxu0 %v347_v22 }
 0x11f   : > { %538 = vmatmul.msk.f32.vlgmr.msra.gmra.mxu0 %vm355_vm2, %v348_v23 }
 0x19c   : > { %v376_v25 = vpop.f32.mrf.mxu0 }
 0x19d   : > { %v377_v26 = vadd.f32 %v376_v25, %v353_v24 }
 0x19f   : > { %v539_v27 = vmul.f32 -1.442695, %v377_v26 }
 0x1a1   : > { %623 = vpow2.f32 %v539_v27 }
 0x1a7   : > { %v624_v28 = vpop.eup %623 }
 0x1a8   : > { %v382_v29 = vadd.f32 1.0, %v624_v28 }
 0x1aa   : > { %625 = vrcp.f32 %v382_v29  ;;  %v394_v33 = vand.u32 2147483648, %v382_v29  ;;  %v392_v35 = vand.u32 2147483647, %v382_v29  ;;  %vm388_vm4 = vweird.f32 %v382_v29 }
 0x1ac   : > { %v395_v37 = vor.u32 1.1754944e-38, %v394_v33  ;;  %vm393_vm6 = vcmp.eq.f32.partialorder %v392_v35, 8.507059e+37 }
 0x1b0   : > { %v626_v30 = vpop.eup %625 }
 0x1b1   : > { %v384_v31 = vmul.f32 %v626_v30, %v382_v29  ;;  %vm389_vm3 = vweird.f32 %v626_v30 }
 0x1b2   : > { %vm390_vm5 = vmor %vm388_vm4, %vm389_vm3 }
 0x1b3   : > { %v385_v32 = vsub.f32 1.0, %v384_v31 }
 0x1b5   : > { %v386_v34 = vmul.f32 %v626_v30, %v385_v32 }
 0x1b7   : > { %v387_v36 = vadd.f32 %v626_v30, %v386_v34 }
 0x1b9   : > { %v391_v38 = vsel %vm390_vm5, %v626_v30, %v387_v36 }
 0x1ba   : > { %v396_v39 = vsel %vm393_vm6, %v395_v37, %v391_v38 }
 0x1bb   : > { %v398_v40 = vmul.f32 %v396_v39, %v377_v26 }
 0x1bd   : > { %399 = vst [vmem:[%s305_s10] sm:$0xff] %v398_v40 }
 0x1be   : > { %714 = shalt.err (!%p711_p13)
}
 0x1bf   : > { %550 = dma.vmem_to_hbm [thread:$0]  (%p861_p9), %s415_s0, 128, %s417_s9, %s401_s21  }
 0x1c0 PF: > { %s428_s26 = sand.u32 1, %s753_s18   ;;  %p560_p0 = pnand %p527_p12, %p868_p11 }
 0x1c1   : > { %s429_s12 = scalar_lea.sflag [#allocation4], %s428_s26 }
 0x1c2   : > { %p561_p1 = pneg %p560_p0 }
 0x1c4   : > { %748 = dma.done.wait (%p561_p1), %s429_s12, 128  }
 0x1c5   : > { %750 = vsyncadd (%p561_p1), %s429_s12, 4294967168  ;;  %s24_s23 = sadd.s32 1, %s773_s23   ;;  %s975_s6 = sld [smem:[#allocation11_spill]] }
 0x1c6   : > { %p21_p2 = scmp.ge.s32.totalorder %s24_s23, 4   ;;  %s976_s18 = smov %s757_s19 }
 0x1c7   : > { %s977_s19 = smov %s761_s20  ;;  %s978_s20 = smov %s866_s7 }
 0x1c8   : > { %s979_s21 = smov %s769_s22  ;;  %23 = sbr.rel (!%p21_p2) target bundleno = 10 (0xa), region = 98 }
 0x1cb   : > { %s980_s22 = smov %s975_s6 }
 0x1cd   :  { %435 = vsyncpa [#allocation3], 1 }
 0x1ce   :  { %437 = vsyncpa [#allocation3 + $0x1], 1 }
 0x1cf   :  { %438 = vsyncpa [#allocation6], 1 }
 0x1d0   :  { %440 = vsyncpa [#allocation6 + $0x1], 1 }
 0x1d1   :  { %441 = vsyncpa [#allocation4], 1 }
 0x1d2   :  { %443 = vsyncpa [#allocation4 + $0x1], 1 }

</bundles_post_ra>
